<compile_context>
chip_gen: v7x
topology: tpu7x:2x2x1
jax: 0.10.0
libtpu: 0.0.40
codegen_flags: <defaults>
</compile_context>

<pallas_src>
import functools

import jax
import jax.numpy as jnp
from jax.experimental import pallas as pl
from jax.experimental.pallas import tpu as pltpu

_LANE = 128


def _layernorm2d_kernel(x_ref, w_ref, b_ref, o_ref, *, eps: float, inv_c: float):
    # x_ref / o_ref: (TILE_N, C, TILE_HW)    w_ref / b_ref: (1, C, 1) float32
    x = x_ref[...].astype(jnp.float32)

    # One pass over x for the channel statistics (C is the sublane axis; the
    # reductions go to the XLU, off the VALU slot).
    s1 = jnp.sum(x, axis=1, keepdims=True)              # (TILE_N, 1, TILE_HW)
    s2 = jnp.sum(x * x, axis=1, keepdims=True)          # (TILE_N, 1, TILE_HW)
    u = s1 * inv_c
    var = s2 * inv_c - u * u
    inv_std = jax.lax.rsqrt(var + eps)                  # per-lane inverse std

    # Fold affine:  w*(x - u)*inv_std + b == x*scale + shift
    scale = w_ref[...] * inv_std                        # (TILE_N, C, TILE_HW)
    shift = b_ref[...] - u * scale
    o_ref[...] = (x * scale + shift).astype(o_ref.dtype)


def _vmem_budget_and_limit():
    """(per-step data budget, scoped vmem_limit_bytes), generation-aware."""
    try:
        cap = pltpu.get_tpu_info().vmem_capacity_bytes
    except Exception:  # pragma: no cover - conservative fallback
        cap = 64 << 20
    if cap >= (128 << 20):           # v5e / v6e: 128 MiB physical VMEM
        return 32 << 20, 64 << 20
    return 16 << 20, 32 << 20        # v7x: 64 MiB physical per TensorCore


def _choose_tiles(N: int, C: int, HW: int, itemsize: int, budget_bytes: int):
    """Pick (TILE_N, TILE_HW) so the block is large but fits the VMEM budget."""
    # Per element: double-buffered input + double-buffered output + ~3 live
    # full-block f32 intermediates inside the kernel body.
    bytes_per_elem = 4 * itemsize + 3 * 4
    max_block_elems = max(budget_bytes // bytes_per_elem, C * min(HW, _LANE))

    if HW <= _LANE:
        tile_hw = HW                                      # full extent (allowed)
    else:
        hw_tiles = pl.cdiv(HW, _LANE)
        by_budget = max(1, max_block_elems // (C * _LANE))
        tile_hw = int(min(hw_tiles, by_budget)) * _LANE   # lane-dense, mult of 128

    tile_n = 1
    if tile_hw >= HW:                                     # whole HW in one block
        tile_n = int(min(N, max(1, max_block_elems // (C * tile_hw))))
    return tile_n, tile_hw


def layernorm2d(x, weight, bias, eps: float = 1e-6):
    """x: (N, C, H, W); weight/bias: (C,). Matches PyTorch LayerNorm2d forward."""
    N, C, H, W = x.shape
    HW = H * W
    itemsize = jnp.dtype(x.dtype).itemsize

    budget, vmem_limit = _vmem_budget_and_limit()
    tile_n, tile_hw = _choose_tiles(N, C, HW, itemsize, budget)

    x2 = x.reshape(N, C, HW)
    w2 = weight.reshape(1, C, 1).astype(jnp.float32)
    b2 = bias.reshape(1, C, 1).astype(jnp.float32)

    kernel = functools.partial(_layernorm2d_kernel, eps=float(eps), inv_c=1.0 / C)

    out = pl.pallas_call(
        kernel,
        out_shape=jax.ShapeDtypeStruct((N, C, HW), x.dtype),
        grid_spec=pltpu.PrefetchScalarGridSpec(
            num_scalar_prefetch=0,
            grid=(pl.cdiv(N, tile_n), pl.cdiv(HW, tile_hw)),
            in_specs=[
                pl.BlockSpec((tile_n, C, tile_hw), lambda n, h: (n, 0, h)),
                pl.BlockSpec((1, C, 1), lambda n, h: (0, 0, 0)),
                pl.BlockSpec((1, C, 1), lambda n, h: (0, 0, 0)),
            ],
            out_specs=pl.BlockSpec((tile_n, C, tile_hw), lambda n, h: (n, 0, h)),
        ),
        compiler_params=pltpu.CompilerParams(
            dimension_semantics=("parallel", "parallel"),
            vmem_limit_bytes=vmem_limit,
        ),
    )(x2, w2, b2)

    return out.reshape(N, C, H, W)


def layernorm2d_ref(x, weight, bias, eps: float = 1e-6):
    """Pure-JAX reference matching the PyTorch forward exactly."""
    u = jnp.mean(x, axis=1, keepdims=True)
    s = jnp.mean((x - u) ** 2, axis=1, keepdims=True)
    xn = (x - u) / jnp.sqrt(s + eps)
    return weight[None, :, None, None] * xn + bias[None, :, None, None]


if __name__ == "__main__":
    key = jax.random.PRNGKey(0)
    N, C, H, W = 2, 4, 16, 16

    x = jax.random.normal(key, (N, C, H, W), dtype=jnp.float32)
    # Deterministic params matching nn.Parameter(torch.ones(C)) / zeros(C).
    weight = jnp.ones((C,), dtype=jnp.float32)
    bias = jnp.zeros((C,), dtype=jnp.float32)

    out = layernorm2d(x, weight, bias)
    out = jax.block_until_ready(out)

    ref = layernorm2d_ref(x, weight, bias)
    assert out.shape == (N, C, H, W)
    assert jnp.allclose(out, ref, atol=1e-5, rtol=1e-5), "mismatch vs reference"

    print("KERNEL_OK")
</pallas_src>

<mosaic_0001>
module attributes {stable_mosaic.version = 11 : i64} {
  func.func @_layernorm2d_kernel(%arg0: i32, %arg1: i32, %arg2: memref<2x4x256xf32, #tpu.memory_space<vmem>>, %arg3: memref<1x4x1xf32, #tpu.memory_space<vmem>>, %arg4: memref<1x4x1xf32, #tpu.memory_space<vmem>>, %arg5: memref<2x4x256xf32, #tpu.memory_space<vmem>>) attributes {dimension_semantics = [#tpu.dimension_semantics<parallel>, #tpu.dimension_semantics<parallel>], iteration_bounds = array<i64: 1, 1>, scalar_prefetch = 0 : i64, scratch_operands = 0 : i64, tpu.core_type = #tpu.core_type<tc>, window_params = [{transform_indices = @transform_0, window_bounds = array<i64: 2, 4, 256>}, {pipeline_mode = #tpu.pipeline_mode<synchronous>, transform_indices = @transform_1, window_bounds = array<i64: 1, 4, 1>}, {pipeline_mode = #tpu.pipeline_mode<synchronous>, transform_indices = @transform_2, window_bounds = array<i64: 1, 4, 1>}, {transform_indices = @transform_3, window_bounds = array<i64: 2, 4, 256>}]} {
    %c0 = arith.constant 0 : index
    %c0_0 = arith.constant 0 : index
    %c0_1 = arith.constant 0 : index
    %0 = vector.load %arg2[%c0, %c0_0, %c0_1] : memref<2x4x256xf32, #tpu.memory_space<vmem>>, vector<2x4x256xf32>
    %cst = arith.constant dense<0.000000e+00> : vector<2x256xf32>
    %1 = vector.multi_reduction <add>, %0, %cst [1] : vector<2x4x256xf32> to vector<2x256xf32>
    %2 = vector.shape_cast %1 : vector<2x256xf32> to vector<2x1x256xf32>
    %3 = arith.mulf %0, %0 : vector<2x4x256xf32>
    %cst_2 = arith.constant dense<0.000000e+00> : vector<2x256xf32>
    %4 = vector.multi_reduction <add>, %3, %cst_2 [1] : vector<2x4x256xf32> to vector<2x256xf32>
    %5 = vector.shape_cast %4 : vector<2x256xf32> to vector<2x1x256xf32>
    %cst_3 = arith.constant 2.500000e-01 : f32
    %6 = vector.broadcast %cst_3 : f32 to vector<2x1x256xf32>
    %7 = arith.mulf %2, %6 : vector<2x1x256xf32>
    %cst_4 = arith.constant 2.500000e-01 : f32
    %8 = vector.broadcast %cst_4 : f32 to vector<2x1x256xf32>
    %9 = arith.mulf %5, %8 : vector<2x1x256xf32>
    %10 = arith.mulf %7, %7 : vector<2x1x256xf32>
    %11 = arith.subf %9, %10 : vector<2x1x256xf32>
    %cst_5 = arith.constant 9.99999997E-7 : f32
    %12 = vector.broadcast %cst_5 : f32 to vector<2x1x256xf32>
    %13 = arith.addf %11, %12 : vector<2x1x256xf32>
    %14 = math.rsqrt %13 : vector<2x1x256xf32>
    %c0_6 = arith.constant 0 : index
    %c0_7 = arith.constant 0 : index
    %c0_8 = arith.constant 0 : index
    %15 = vector.load %arg3[%c0_6, %c0_7, %c0_8] : memref<1x4x1xf32, #tpu.memory_space<vmem>>, vector<1x4x1xf32>
    %16 = vector.broadcast %15 : vector<1x4x1xf32> to vector<2x4x256xf32>
    %17 = vector.broadcast %14 : vector<2x1x256xf32> to vector<2x4x256xf32>
    %18 = arith.mulf %16, %17 : vector<2x4x256xf32>
    %c0_9 = arith.constant 0 : index
    %c0_10 = arith.constant 0 : index
    %c0_11 = arith.constant 0 : index
    %19 = vector.load %arg4[%c0_9, %c0_10, %c0_11] : memref<1x4x1xf32, #tpu.memory_space<vmem>>, vector<1x4x1xf32>
    %20 = vector.broadcast %7 : vector<2x1x256xf32> to vector<2x4x256xf32>
    %21 = arith.mulf %20, %18 : vector<2x4x256xf32>
    %22 = vector.broadcast %19 : vector<1x4x1xf32> to vector<2x4x256xf32>
    %23 = arith.subf %22, %21 : vector<2x4x256xf32>
    %24 = arith.mulf %0, %18 : vector<2x4x256xf32>
    %25 = arith.addf %24, %23 : vector<2x4x256xf32>
    %c0_12 = arith.constant 0 : index
    %c0_13 = arith.constant 0 : index
    %c0_14 = arith.constant 0 : index
    %26 = vector.load %arg5[%c0_12, %c0_13, %c0_14] : memref<2x4x256xf32, #tpu.memory_space<vmem>>, vector<2x4x256xf32>
    tpu.vector_store %arg5[%c0_12, %c0_13, %c0_14], %25 {strides = array<i32>} : memref<2x4x256xf32, #tpu.memory_space<vmem>>, vector<2x4x256xf32>,
    return
  }
  func.func @transform_0(%arg0: i32, %arg1: i32) -> (i32, i32, i32) {
    %c0_i32 = arith.constant 0 : i32
    %c0_i32_0 = arith.constant 0 : i32
    return %arg0, %c0_i32, %arg1 : i32, i32, i32
  }
  func.func @transform_1(%arg0: i32, %arg1: i32) -> (i32, i32, i32) {
    %c0_i32 = arith.constant 0 : i32
    %c0_i32_0 = arith.constant 0 : i32
    %c0_i32_1 = arith.constant 0 : i32
    %c0_i32_2 = arith.constant 0 : i32
    return %c0_i32, %c0_i32_0, %c0_i32_1 : i32, i32, i32
  }
  func.func @transform_2(%arg0: i32, %arg1: i32) -> (i32, i32, i32) {
    %c0_i32 = arith.constant 0 : i32
    %c0_i32_0 = arith.constant 0 : i32
    %c0_i32_1 = arith.constant 0 : i32
    %c0_i32_2 = arith.constant 0 : i32
    return %c0_i32, %c0_i32_0, %c0_i32_1 : i32, i32, i32
  }
  func.func @transform_3(%arg0: i32, %arg1: i32) -> (i32, i32, i32) {
    %c0_i32 = arith.constant 0 : i32
    %c0_i32_0 = arith.constant 0 : i32
    return %arg0, %c0_i32, %arg1 : i32, i32, i32
  }
}

</mosaic_0001>

<bundles_post_ra>
// kernel: tpu_custom_call.1
= control target key start
LH: loop header
LB: loop body
LE: loop exit
PB: predicated region body
PF: predicated region fallthrough
CT: control target
= control target key end

     0   :  { %8 = vsyncpa [#allocation3], 0  ;;  %s338_s0 = inlined_call_operand.hbm [shape: f32[2,4,256], index: 0, kind: input, shape index: {}]   ;;  %s339_s1 = inlined_call_operand.vmem [shape: f32[1,4,1], index: 1, kind: input, shape index: {}]   ;;  %s340_s2 = inlined_call_operand.vmem [shape: f32[1,4,1], index: 2, kind: input, shape index: {}]   ;;  %s341_s3 = inlined_call_operand.hbm [shape: f32[2,4,256], index: 3, kind: output, shape index: {}]  }
   0x1   :  { %9 = vsyncpa [#allocation4], 0  ;;  %s253_s12 = smov [#allocation2]   ;;  %s205_s16 = scalar_lea.hbm %s338_s0, 256 }
   0x2   :  { %s15_s13 = sshll.u32 %s253_s12, 4  ;;  %p206_p0 = scmp.ne.s32.totalorder %s338_s0, %s205_s16  ;;  %s16_s13 = int_to_ptr.vmem [resolvable:$true] %s15_s13 }
   0x3   :  { %p209_p1 = scmp.lt.u32.totalorder %s205_s16, %s338_s0 }
   0x5   :  { %p211_p2 = pnand %p209_p1, %p206_p0 }
   0x7   :  { %214 = shalt.err (!%p211_p2)
}
   0x8   :  { %s215_s21 = scalar_lea.vmem %s16_s13, 256  ;;  %p220_p4 = scmp.lt.s32.totalorder %s16_s13, %s16_s13 }
   0x9   :  { %p216_p3 = scmp.ne.s32.totalorder %s16_s13, %s215_s21  ;;  %p221_p5 = scmp.lt.s32.totalorder %s215_s21, %s215_s21 }
   0xb   :  { %p222_p6 = por %p221_p5, %p220_p4 }
   0xd   :  { %p223_p7 = pnand %p222_p6, %p216_p3 }
   0xf   :  { %226 = shalt.err (!%p223_p7)
}
  0x10   :  { %s254_s22 = smov 128   ;;  %s255_s23 = smov 8  }
  0x11   :  { %21 = dma.hbm_to_vmem [thread:$0]  %s338_s0, 256, %s16_s13, [#allocation3], %s254_s22, %s254_s22, %s255_s23  }
  0x12   :  { %249 = dma.done.wait [#allocation3], 256  }
  0x13   :  { %250 = vsyncadd [#allocation3], 4294967040  ;;  %v256_v0 = vmov 0   ;;  %v126_v1 = vld [vmem:[%s339_s1] sm:$0xf]  ;;  %v301_v4 = vld [vmem:[#allocation2 + $0x8] sm:$0xff] }
  0x14   :  { %194 = vset.pattern.permute.xlu0 %v256_v0  ;;  %v136_v2 = vld [vmem:[%s340_s2] sm:$0xf]  ;;  %vm37_vm0 = vcmask 1043456   ;;  %v34_v7 = vcombine.high %v301_v4, %v301_v4  ;;  %v67_v8 = vmul.f32 %v301_v4, %v301_v4  ;;  %s257_s0 = smov [#allocation5]  }
  0x15   :  { %129 = vperm.xlu0 %194, %v126_v1   ;;  %v299_v3 = vld [vmem:[#allocation2] sm:$0xff]  ;;  %v52_v12 = vsel %vm37_vm0, %v301_v4, 0.0  ;;  %s177_s1 = sshll.u32 %s257_s0, 4  ;;  %s178_s1 = int_to_ptr.vmem [resolvable:$true] %s177_s1 }
  0x16   :  { %v33_v5 = vcombine.high %v299_v3, %v299_v3  ;;  %v66_v6 = vmul.f32 %v299_v3, %v299_v3  ;;  %v38_v9 = vsel %vm37_vm0, %v299_v3, 0.0  ;;  %v59_v14 = vsel %vm37_vm0, %v34_v7, 0.0  ;;  %s227_s2 = scalar_lea.vmem %s178_s1, 256  ;;  %p232_p9 = scmp.lt.s32.totalorder %s178_s1, %s178_s1 }
  0x17   :  { %v39_v13 = vrot.slane %v38_v9, 4  ;;  %v71_v15 = vcombine.high %v67_v8, %v67_v8  ;;  %v53_v18 = vrot.slane %v52_v12, 4  ;;  %v60_v20 = vrot.slane %v59_v14, 4  ;;  %p228_p8 = scmp.ne.s32.totalorder %s178_s1, %s227_s2  ;;  %p233_p10 = scmp.lt.s32.totalorder %s227_s2, %s227_s2 }
  0x18   :  { %v45_v10 = vsel %vm37_vm0, %v33_v5, 0.0  ;;  %v70_v11 = vcombine.high %v66_v6, %v66_v6  ;;  %v74_v17 = vsel %vm37_vm0, %v66_v6, 0.0  ;;  %v88_v21 = vsel %vm37_vm0, %v67_v8, 0.0 }
  0x19   :  { %143 = vperm.xlu0 %194, %v136_v2   ;;  %v46_v16 = vrot.slane %v45_v10, 4  ;;  %v40_v22 = vadd.f32 %v39_v13, %v38_v9  ;;  %v75_v23 = vrot.slane %v74_v17, 4  ;;  %v95_v24 = vsel %vm37_vm0, %v71_v15, 0.0  ;;  %p234_p11 = por %p233_p10, %p232_p9 }
  0x1a   :  { %v81_v19 = vsel %vm37_vm0, %v70_v11, 0.0  ;;  %v54_v27 = vadd.f32 %v53_v18, %v52_v12  ;;  %v89_v28 = vrot.slane %v88_v21, 4  ;;  %v61_v29 = vadd.f32 %v60_v20, %v59_v14 }
  0x1b   :  { %v47_v25 = vadd.f32 %v46_v16, %v45_v10  ;;  %v82_v26 = vrot.slane %v81_v19, 4  ;;  %v96_v30 = vrot.slane %v95_v24, 4  ;;  %v41_v31 = vrot.slane %v40_v22, 2  ;;  %p235_p12 = pnand %p234_p11, %p228_p8 }
  0x1c   :  { %v76_v32 = vadd.f32 %v75_v23, %v74_v17  ;;  %v55_v35 = vrot.slane %v54_v27, 2  ;;  %v90_v36 = vadd.f32 %v89_v28, %v88_v21  ;;  %v62_v37 = vrot.slane %v61_v29, 2 }
  0x1d   :  { %v48_v33 = vrot.slane %v47_v25, 2  ;;  %v83_v34 = vadd.f32 %v82_v26, %v81_v19  ;;  %v97_v38 = vadd.f32 %v96_v30, %v95_v24  ;;  %v42_v39 = vadd.f32 %v41_v31, %v40_v22 }
  0x1e   :  { %v77_v40 = vrot.slane %v76_v32, 2  ;;  %v56_v43 = vadd.f32 %v55_v35, %v54_v27  ;;  %v91_v44 = vrot.slane %v90_v36, 2  ;;  %v63_v45 = vadd.f32 %v62_v37, %v61_v29 }
  0x1f   :  { %v49_v41 = vadd.f32 %v48_v33, %v47_v25  ;;  %v84_v42 = vrot.slane %v83_v34, 2  ;;  %v98_v46 = vrot.slane %v97_v38, 2  ;;  %v43_v47 = vrot.slane %v42_v39, 1 }
  0x20   :  { %v78_v48 = vadd.f32 %v77_v40, %v76_v32  ;;  %v57_v51 = vrot.slane %v56_v43, 1  ;;  %v92_v52 = vadd.f32 %v91_v44, %v90_v36  ;;  %v64_v53 = vrot.slane %v63_v45, 1 }
  0x21   :  { %v50_v49 = vrot.slane %v49_v41, 1  ;;  %v85_v50 = vadd.f32 %v84_v42, %v83_v34  ;;  %v99_v54 = vadd.f32 %v98_v46, %v97_v38  ;;  %v44_v55 = vadd.f32 %v43_v47, %v42_v39 }
  0x22   :  { %v79_v56 = vrot.slane %v78_v48, 1  ;;  %v58_v59 = vadd.f32 %v57_v51, %v56_v43  ;;  %v93_v60 = vrot.slane %v92_v52, 1  ;;  %v65_v61 = vadd.f32 %v64_v53, %v63_v45 }
  0x23   :  { %v51_v57 = vadd.f32 %v50_v49, %v49_v41  ;;  %v86_v58 = vrot.slane %v85_v50, 1  ;;  %v100_v62 = vrot.slane %v99_v54, 1  ;;  %v102_v0 = vmul.f32 0.25, %v44_v55 }
  0x24   :  { %v80_v63 = vadd.f32 %v79_v56, %v78_v48  ;;  %v94_v5 = vadd.f32 %v93_v60, %v92_v52  ;;  %v104_v6 = vmul.f32 0.25, %v58_v59  ;;  %v105_v8 = vmul.f32 0.25, %v65_v61 }
  0x25   :  { %v87_v1 = vadd.f32 %v86_v58, %v85_v50  ;;  %v103_v2 = vmul.f32 0.25, %v51_v57  ;;  %v101_v7 = vadd.f32 %v100_v62, %v99_v54  ;;  %v110_v10 = vmul.f32 %v102_v0, %v102_v0 }
  0x26   :  { %v106_v9 = vmul.f32 0.25, %v80_v63  ;;  %v108_v13 = vmul.f32 0.25, %v94_v5  ;;  %v112_v14 = vmul.f32 %v104_v6, %v104_v6  ;;  %v113_v16 = vmul.f32 %v105_v8, %v105_v8 }
  0x27   :  { %v107_v11 = vmul.f32 0.25, %v87_v1  ;;  %v111_v12 = vmul.f32 %v103_v2, %v103_v2  ;;  %v109_v15 = vmul.f32 0.25, %v101_v7 }
  0x28   :  { %v114_v17 = vsub.f32 %v106_v9, %v110_v10  ;;  %v116_v19 = vsub.f32 %v108_v13, %v112_v14 }
  0x29   :  { %v115_v18 = vsub.f32 %v107_v11, %v111_v12  ;;  %v117_v20 = vsub.f32 %v109_v15, %v113_v16 }
  0x2a   :  { %v118_v21 = vadd.f32 1e-06, %v114_v17  ;;  %v120_v23 = vadd.f32 1e-06, %v116_v19 }
  0x2b   :  { %v119_v22 = vadd.f32 1e-06, %v115_v18  ;;  %v121_v24 = vadd.f32 1e-06, %v117_v20 }
  0x2c   :  { %197 = vrsqrt.f32 %v118_v21 }
  0x2d   :  { %199 = vrsqrt.f32 %v119_v22 }
  0x2e   :  { %201 = vrsqrt.f32 %v120_v23 }
  0x2f   :  { %203 = vrsqrt.f32 %v121_v24 }
  0x36   :  { %v198_v25 = vpop.eup %197 }
  0x37   :  { %v200_v26 = vpop.eup %199 }
  0x38   :  { %v202_v27 = vpop.eup %201 }
  0x39   :  { %v204_v28 = vpop.eup %203 }
  0x94   :  { %v130_v29 = vpop.permute.xlu0 %129 }
  0x95   :  { %v132_v30 = vmul.f32 %v198_v25, %v130_v29  ;;  %v133_v31 = vmul.f32 %v200_v26, %v130_v29  ;;  %v134_v32 = vmul.f32 %v202_v27, %v130_v29  ;;  %v135_v33 = vmul.f32 %v204_v28, %v130_v29 }
  0x97   :  { %v154_v34 = vcombine.low %v132_v30, %v133_v31  ;;  %v137_v35 = vmul.f32 %v132_v30, %v102_v0  ;;  %v138_v36 = vmul.f32 %v133_v31, %v103_v2  ;;  %v155_v37 = vcombine.low %v134_v32, %v135_v33 }
  0x98   :  { %v144_v38 = vpop.permute.xlu0 %143  ;;  %v139_v39 = vmul.f32 %v134_v32, %v104_v6  ;;  %v140_v40 = vmul.f32 %v135_v33, %v105_v8 }
  0x99   :  { %v146_v41 = vsub.f32 %v144_v38, %v137_v35  ;;  %v147_v42 = vsub.f32 %v144_v38, %v138_v36  ;;  %v158_v46 = vmul.f32 %v154_v34, %v299_v3  ;;  %v159_v48 = vmul.f32 %v155_v37, %v301_v4 }
  0x9a   :  { %v148_v43 = vsub.f32 %v144_v38, %v139_v39  ;;  %v149_v44 = vsub.f32 %v144_v38, %v140_v40 }
  0x9b   :  { %v164_v45 = vcombine.low %v146_v41, %v147_v42 }
  0x9c   :  { %v165_v47 = vcombine.low %v148_v43, %v149_v44 }
  0x9d   :  { %v168_v49 = vadd.f32 %v164_v45, %v158_v46 }
  0x9e   :  { %v169_v50 = vadd.f32 %v165_v47, %v159_v48 }
  0x9f   :  { %170 = vst [vmem:[#allocation5] sm:$0xff] %v168_v49 }
  0xa0   :  { %171 = vst [vmem:[#allocation5 + $0x8] sm:$0xff] %v169_v50 }
  0xa1   :  { %238 = shalt.err (!%p235_p12)
}
  0xa2   :  { %s239_s5 = scalar_lea.hbm %s341_s3, 256 }
  0xa3   :  { %p240_p13 = scmp.ne.s32.totalorder %s341_s3, %s239_s5  ;;  %p243_p0 = scmp.lt.u32.totalorder %s239_s5, %s341_s3 }
  0xa5   :  { %p245_p1 = pnand %p243_p0, %p240_p13 }
  0xa7   :  { %248 = shalt.err (!%p245_p1)
}
  0xa8   :  { %183 = dma.vmem_to_hbm [thread:$0]  %s178_s1, 256, %s341_s3, [#allocation4], %s254_s22, %s254_s22, %s255_s23  }
  0xa9   :  { %251 = dma.done.wait [#allocation4], 256  }
  0xaa   :  { %252 = vsyncadd [#allocation4], 4294967040 }
  0xab   :  { %187 = vsyncpa [#allocation3], 1 }
  0xac   :  { %188 = vsyncpa [#allocation4], 1 }

</bundles_post_ra>
